<compile_context>
chip_gen: v5e
topology: v5e:2x2
jax: 0.10.0
libtpu: 0.0.40
codegen_flags: <defaults>
</compile_context>

<pallas_src>
import functools

import jax
import jax.numpy as jnp
from jax.experimental import pallas as pl
from jax.experimental.pallas import tpu as pltpu


def fused_linear_relu_conv_kernel(p_ref, x_ref, out_ref, *, B, C, KOUT, C_out, KH, KW):
    """Fused permute + linear + relu + 2x2 valid conv.

    p_ref  : SMEM (24,) f32 -- packed params: lin_w(KOUT*C) | lin_b(KOUT) |
                                              conv_w(C_out*B*KH*KW) | conv_b(C_out)
    x_ref  : VMEM (B*C, S) f32 -- input flattened to a single sublane-tiled slab
                                  (row b*C+c holds x1[b, c, :], S on the lane axis)
    out_ref: VMEM (C_out, H_out) f32 -- conv output (W_out == 1 axis added outside)
    """
    H_out = out_ref.shape[1]

    # Packed-parameter offsets (static Python ints).
    off_lw = 0
    off_lb = off_lw + KOUT * C
    off_cw = off_lb + KOUT
    off_cb = off_cw + C_out * B * KH * KW

    # Hoist all scalar parameter reads (cheap SMEM sld, done once).
    lw = [[p_ref[off_lw + o * C + c] for c in range(C)] for o in range(KOUT)]
    lb = [p_ref[off_lb + o] for o in range(KOUT)]
    cw = [p_ref[off_cw + i] for i in range(C_out * B * KH * KW)]
    cb = [p_ref[off_cb + co] for co in range(C_out)]

    # Row (b, c) of the flattened input: x1[b, c, :] as a (1, S) lane slab.
    def xrow(b, c):
        r = b * C + c
        return x_ref[r:r + 1, :]

    # ---- Linear (contraction over C unrolled as VPU FMAs) + ReLU ----
    # v3[o][b] is a (1, S) slab with S on the lane axis. This is exactly the
    # (W=o, C_img=b, H=s) orientation the conv consumes -> no transposes anywhere.
    v3 = [[None] * B for _ in range(KOUT)]
    for o in range(KOUT):
        for b in range(B):
            s = lw[o][0] * xrow(b, 0)
            for c in range(1, C):
                s = s + lw[o][c] * xrow(b, c)
            v3[o][b] = jnp.maximum(s + lb[o], 0.0)           # (1, S)

    # Hoist the kh-shifted operands once (reused by every output channel):
    # v3s[o][b][kh] = v3[o][b][:, kh:kh+H_out]  (kh=0 is a plain view; kh>0 is
    # one lane rotate + mask, emitted exactly once instead of once per co).
    v3s = [[[v3[o][b][:, kh:kh + H_out] for kh in range(KH)]
            for b in range(B)] for o in range(KOUT)]

    # ---- 2x2 valid conv on the unbatched CHW image (C_img=b, H=s, W=o) ----
    # One fused FMA chain per output channel; assemble all rows and store once.
    rows = []
    for co in range(C_out):
        acc = None
        for ci in range(B):
            for kh in range(KH):
                for kw in range(KW):
                    w = cw[((co * B + ci) * KH + kh) * KW + kw]
                    term = w * v3s[kw][ci][kh]               # (1, H_out)
                    acc = term if acc is None else acc + term
        rows.append(acc + cb[co])
    out_ref[...] = jnp.concatenate(rows, axis=0)             # single store


@jax.jit
def model_forward(x1, lin_w, lin_b, conv_w, conv_b):
    """x1: (B, C, S).  Returns (C_out, H_out, 1) -- matches torch's Conv2d applied
    to the unbatched 3-D relu output."""
    B, C, S = x1.shape
    C_out, C_in, KH, KW = conv_w.shape
    KOUT, KIN = lin_w.shape
    assert C_in == B and KIN == C and KW == KOUT
    H_out = S - KH + 1

    # Single packed parameter buffer -> one tiny SMEM transfer instead of four.
    # (Fused into the same XLA executable by jit; weights are tiny/static.)
    params = jnp.concatenate([
        lin_w.reshape(-1).astype(jnp.float32),
        lin_b.reshape(-1).astype(jnp.float32),
        conv_w.reshape(-1).astype(jnp.float32),
        conv_b.reshape(-1).astype(jnp.float32),
    ])

    # Flatten to one (B*C, S) slab -> a single (8,128)-padded VMEM tile.
    x_flat = x1.reshape(B * C, S).astype(jnp.float32)

    kernel = functools.partial(
        fused_linear_relu_conv_kernel,
        B=B, C=C, KOUT=KOUT, C_out=C_out, KH=KH, KW=KW)

    out2d = pl.pallas_call(
        kernel,
        out_shape=jax.ShapeDtypeStruct((C_out, H_out), jnp.float32),
        in_specs=[pl.BlockSpec(memory_space=pltpu.MemorySpace.SMEM),
                  pl.BlockSpec(memory_space=pltpu.MemorySpace.VMEM)],
        out_specs=pl.BlockSpec(memory_space=pltpu.MemorySpace.VMEM),
    )(params, x_flat)

    return out2d[:, :, None]                                 # (C_out, H_out, 1)


if __name__ == "__main__":
    key = jax.random.PRNGKey(0)
    k1, k2, k3, k4, k5 = jax.random.split(key, 5)

    # Small shapes consistent with the module: Linear(2,2) needs last dim 2 after
    # the permute, Conv2d(2,2,2) needs leading dim 2 on the 3-D (unbatched) input.
    x1 = jax.random.normal(k1, (2, 2, 8), jnp.float32)               # (B=2, C=2, S=8)
    lin_w = jax.random.normal(k2, (2, 2), jnp.float32) * 0.5         # Linear.weight
    lin_b = jax.random.normal(k3, (2,), jnp.float32) * 0.1           # Linear.bias
    conv_w = jax.random.normal(k4, (2, 2, 2, 2), jnp.float32) * 0.5  # Conv2d.weight
    conv_b = jax.random.normal(k5, (2,), jnp.float32) * 0.1          # Conv2d.bias

    out = jax.block_until_ready(model_forward(x1, lin_w, lin_b, conv_w, conv_b))

    # plain-JAX reference
    v1 = jnp.transpose(x1, (0, 2, 1))
    v2 = v1 @ lin_w.T + lin_b
    v3 = jnp.maximum(v2, 0.0)                                        # (2, 8, 2) == CHW
    ref = jax.lax.conv_general_dilated(
        v3[None], conv_w, window_strides=(1, 1), padding="VALID",
        dimension_numbers=("NCHW", "OIHW", "NCHW"))[0] + conv_b[:, None, None]

    assert out.shape == ref.shape == (2, 7, 1), (out.shape, ref.shape)
    assert jnp.allclose(out, ref, atol=1e-5), (out, ref)
    print("KERNEL_OK")
</pallas_src>

<mosaic_0001>
module attributes {stable_mosaic.version = 11 : i64} {
  func.func @fused_linear_relu_conv_kernel(%arg0: memref<24xf32, #tpu.memory_space<smem>>, %arg1: memref<4x8xf32, #tpu.memory_space<vmem>>, %arg2: memref<2x7xf32, #tpu.memory_space<vmem>>) attributes {dimension_semantics = [], scalar_prefetch = 0 : i64, scratch_operands = 0 : i64, tpu.core_type = #tpu.core_type<tc>} {
    %c0 = arith.constant 0 : index
    %0 = memref.load %arg0[%c0] : memref<24xf32, #tpu.memory_space<smem>>
    %c1 = arith.constant 1 : index
    %1 = memref.load %arg0[%c1] : memref<24xf32, #tpu.memory_space<smem>>
    %c2 = arith.constant 2 : index
    %2 = memref.load %arg0[%c2] : memref<24xf32, #tpu.memory_space<smem>>
    %c3 = arith.constant 3 : index
    %3 = memref.load %arg0[%c3] : memref<24xf32, #tpu.memory_space<smem>>
    %c4 = arith.constant 4 : index
    %4 = memref.load %arg0[%c4] : memref<24xf32, #tpu.memory_space<smem>>
    %c5 = arith.constant 5 : index
    %5 = memref.load %arg0[%c5] : memref<24xf32, #tpu.memory_space<smem>>
    %c6 = arith.constant 6 : index
    %6 = memref.load %arg0[%c6] : memref<24xf32, #tpu.memory_space<smem>>
    %c7 = arith.constant 7 : index
    %7 = memref.load %arg0[%c7] : memref<24xf32, #tpu.memory_space<smem>>
    %c8 = arith.constant 8 : index
    %8 = memref.load %arg0[%c8] : memref<24xf32, #tpu.memory_space<smem>>
    %c9 = arith.constant 9 : index
    %9 = memref.load %arg0[%c9] : memref<24xf32, #tpu.memory_space<smem>>
    %c10 = arith.constant 10 : index
    %10 = memref.load %arg0[%c10] : memref<24xf32, #tpu.memory_space<smem>>
    %c11 = arith.constant 11 : index
    %11 = memref.load %arg0[%c11] : memref<24xf32, #tpu.memory_space<smem>>
    %c12 = arith.constant 12 : index
    %12 = memref.load %arg0[%c12] : memref<24xf32, #tpu.memory_space<smem>>
    %c13 = arith.constant 13 : index
    %13 = memref.load %arg0[%c13] : memref<24xf32, #tpu.memory_space<smem>>
    %c14 = arith.constant 14 : index
    %14 = memref.load %arg0[%c14] : memref<24xf32, #tpu.memory_space<smem>>
    %c15 = arith.constant 15 : index
    %15 = memref.load %arg0[%c15] : memref<24xf32, #tpu.memory_space<smem>>
    %c16 = arith.constant 16 : index
    %16 = memref.load %arg0[%c16] : memref<24xf32, #tpu.memory_space<smem>>
    %c17 = arith.constant 17 : index
    %17 = memref.load %arg0[%c17] : memref<24xf32, #tpu.memory_space<smem>>
    %c18 = arith.constant 18 : index
    %18 = memref.load %arg0[%c18] : memref<24xf32, #tpu.memory_space<smem>>
    %c19 = arith.constant 19 : index
    %19 = memref.load %arg0[%c19] : memref<24xf32, #tpu.memory_space<smem>>
    %c20 = arith.constant 20 : index
    %20 = memref.load %arg0[%c20] : memref<24xf32, #tpu.memory_space<smem>>
    %c21 = arith.constant 21 : index
    %21 = memref.load %arg0[%c21] : memref<24xf32, #tpu.memory_space<smem>>
    %c22 = arith.constant 22 : index
    %22 = memref.load %arg0[%c22] : memref<24xf32, #tpu.memory_space<smem>>
    %c23 = arith.constant 23 : index
    %23 = memref.load %arg0[%c23] : memref<24xf32, #tpu.memory_space<smem>>
    %c0_0 = arith.constant 0 : index
    %c0_1 = arith.constant 0 : index
    %24 = vector.load %arg1[%c0_0, %c0_1] : memref<4x8xf32, #tpu.memory_space<vmem>>, vector<1x8xf32>
    %25 = vector.broadcast %0 : f32 to vector<1x8xf32>
    %26 = arith.mulf %25, %24 : vector<1x8xf32>
    %c1_2 = arith.constant 1 : index
    %c0_3 = arith.constant 0 : index
    %27 = vector.load %arg1[%c1_2, %c0_3] : memref<4x8xf32, #tpu.memory_space<vmem>>, vector<1x8xf32>
    %28 = vector.broadcast %1 : f32 to vector<1x8xf32>
    %29 = arith.mulf %28, %27 : vector<1x8xf32>
    %30 = arith.addf %26, %29 : vector<1x8xf32>
    %31 = vector.broadcast %4 : f32 to vector<1x8xf32>
    %32 = arith.addf %30, %31 : vector<1x8xf32>
    %cst = arith.constant 0.000000e+00 : f32
    %33 = vector.broadcast %cst : f32 to vector<1x8xf32>
    %34 = arith.maximumf %32, %33 : vector<1x8xf32>
    %c2_4 = arith.constant 2 : index
    %c0_5 = arith.constant 0 : index
    %35 = vector.load %arg1[%c2_4, %c0_5] : memref<4x8xf32, #tpu.memory_space<vmem>>, vector<1x8xf32>
    %36 = vector.broadcast %0 : f32 to vector<1x8xf32>
    %37 = arith.mulf %36, %35 : vector<1x8xf32>
    %c3_6 = arith.constant 3 : index
    %c0_7 = arith.constant 0 : index
    %38 = vector.load %arg1[%c3_6, %c0_7] : memref<4x8xf32, #tpu.memory_space<vmem>>, vector<1x8xf32>
    %39 = vector.broadcast %1 : f32 to vector<1x8xf32>
    %40 = arith.mulf %39, %38 : vector<1x8xf32>
    %41 = arith.addf %37, %40 : vector<1x8xf32>
    %42 = vector.broadcast %4 : f32 to vector<1x8xf32>
    %43 = arith.addf %41, %42 : vector<1x8xf32>
    %cst_8 = arith.constant 0.000000e+00 : f32
    %44 = vector.broadcast %cst_8 : f32 to vector<1x8xf32>
    %45 = arith.maximumf %43, %44 : vector<1x8xf32>
    %c0_9 = arith.constant 0 : index
    %c0_10 = arith.constant 0 : index
    %46 = vector.load %arg1[%c0_9, %c0_10] : memref<4x8xf32, #tpu.memory_space<vmem>>, vector<1x8xf32>
    %47 = vector.broadcast %2 : f32 to vector<1x8xf32>
    %48 = arith.mulf %47, %46 : vector<1x8xf32>
    %c1_11 = arith.constant 1 : index
    %c0_12 = arith.constant 0 : index
    %49 = vector.load %arg1[%c1_11, %c0_12] : memref<4x8xf32, #tpu.memory_space<vmem>>, vector<1x8xf32>
    %50 = vector.broadcast %3 : f32 to vector<1x8xf32>
    %51 = arith.mulf %50, %49 : vector<1x8xf32>
    %52 = arith.addf %48, %51 : vector<1x8xf32>
    %53 = vector.broadcast %5 : f32 to vector<1x8xf32>
    %54 = arith.addf %52, %53 : vector<1x8xf32>
    %cst_13 = arith.constant 0.000000e+00 : f32
    %55 = vector.broadcast %cst_13 : f32 to vector<1x8xf32>
    %56 = arith.maximumf %54, %55 : vector<1x8xf32>
    %c2_14 = arith.constant 2 : index
    %c0_15 = arith.constant 0 : index
    %57 = vector.load %arg1[%c2_14, %c0_15] : memref<4x8xf32, #tpu.memory_space<vmem>>, vector<1x8xf32>
    %58 = vector.broadcast %2 : f32 to vector<1x8xf32>
    %59 = arith.mulf %58, %57 : vector<1x8xf32>
    %c3_16 = arith.constant 3 : index
    %c0_17 = arith.constant 0 : index
    %60 = vector.load %arg1[%c3_16, %c0_17] : memref<4x8xf32, #tpu.memory_space<vmem>>, vector<1x8xf32>
    %61 = vector.broadcast %3 : f32 to vector<1x8xf32>
    %62 = arith.mulf %61, %60 : vector<1x8xf32>
    %63 = arith.addf %59, %62 : vector<1x8xf32>
    %64 = vector.broadcast %5 : f32 to vector<1x8xf32>
    %65 = arith.addf %63, %64 : vector<1x8xf32>
    %cst_18 = arith.constant 0.000000e+00 : f32
    %66 = vector.broadcast %cst_18 : f32 to vector<1x8xf32>
    %67 = arith.maximumf %65, %66 : vector<1x8xf32>
    %68 = vector.extract_strided_slice %34 {offsets = [0, 0], sizes = [1, 7], strides = [1, 1]} : vector<1x8xf32> to vector<1x7xf32>
    %69 = vector.extract_strided_slice %34 {offsets = [0, 1], sizes = [1, 7], strides = [1, 1]} : vector<1x8xf32> to vector<1x7xf32>
    %70 = vector.extract_strided_slice %45 {offsets = [0, 0], sizes = [1, 7], strides = [1, 1]} : vector<1x8xf32> to vector<1x7xf32>
    %71 = vector.extract_strided_slice %45 {offsets = [0, 1], sizes = [1, 7], strides = [1, 1]} : vector<1x8xf32> to vector<1x7xf32>
    %72 = vector.extract_strided_slice %56 {offsets = [0, 0], sizes = [1, 7], strides = [1, 1]} : vector<1x8xf32> to vector<1x7xf32>
    %73 = vector.extract_strided_slice %56 {offsets = [0, 1], sizes = [1, 7], strides = [1, 1]} : vector<1x8xf32> to vector<1x7xf32>
    %74 = vector.extract_strided_slice %67 {offsets = [0, 0], sizes = [1, 7], strides = [1, 1]} : vector<1x8xf32> to vector<1x7xf32>
    %75 = vector.extract_strided_slice %67 {offsets = [0, 1], sizes = [1, 7], strides = [1, 1]} : vector<1x8xf32> to vector<1x7xf32>
    %76 = vector.broadcast %6 : f32 to vector<1x7xf32>
    %77 = arith.mulf %76, %68 : vector<1x7xf32>
    %78 = vector.broadcast %7 : f32 to vector<1x7xf32>
    %79 = arith.mulf %78, %72 : vector<1x7xf32>
    %80 = arith.addf %77, %79 : vector<1x7xf32>
    %81 = vector.broadcast %8 : f32 to vector<1x7xf32>
    %82 = arith.mulf %81, %69 : vector<1x7xf32>
    %83 = arith.addf %80, %82 : vector<1x7xf32>
    %84 = vector.broadcast %9 : f32 to vector<1x7xf32>
    %85 = arith.mulf %84, %73 : vector<1x7xf32>
    %86 = arith.addf %83, %85 : vector<1x7xf32>
    %87 = vector.broadcast %10 : f32 to vector<1x7xf32>
    %88 = arith.mulf %87, %70 : vector<1x7xf32>
    %89 = arith.addf %86, %88 : vector<1x7xf32>
    %90 = vector.broadcast %11 : f32 to vector<1x7xf32>
    %91 = arith.mulf %90, %74 : vector<1x7xf32>
    %92 = arith.addf %89, %91 : vector<1x7xf32>
    %93 = vector.broadcast %12 : f32 to vector<1x7xf32>
    %94 = arith.mulf %93, %71 : vector<1x7xf32>
    %95 = arith.addf %92, %94 : vector<1x7xf32>
    %96 = vector.broadcast %13 : f32 to vector<1x7xf32>
    %97 = arith.mulf %96, %75 : vector<1x7xf32>
    %98 = arith.addf %95, %97 : vector<1x7xf32>
    %99 = vector.broadcast %22 : f32 to vector<1x7xf32>
    %100 = arith.addf %98, %99 : vector<1x7xf32>
    %101 = vector.broadcast %14 : f32 to vector<1x7xf32>
    %102 = arith.mulf %101, %68 : vector<1x7xf32>
    %103 = vector.broadcast %15 : f32 to vector<1x7xf32>
    %104 = arith.mulf %103, %72 : vector<1x7xf32>
    %105 = arith.addf %102, %104 : vector<1x7xf32>
    %106 = vector.broadcast %16 : f32 to vector<1x7xf32>
    %107 = arith.mulf %106, %69 : vector<1x7xf32>
    %108 = arith.addf %105, %107 : vector<1x7xf32>
    %109 = vector.broadcast %17 : f32 to vector<1x7xf32>
    %110 = arith.mulf %109, %73 : vector<1x7xf32>
    %111 = arith.addf %108, %110 : vector<1x7xf32>
    %112 = vector.broadcast %18 : f32 to vector<1x7xf32>
    %113 = arith.mulf %112, %70 : vector<1x7xf32>
    %114 = arith.addf %111, %113 : vector<1x7xf32>
    %115 = vector.broadcast %19 : f32 to vector<1x7xf32>
    %116 = arith.mulf %115, %74 : vector<1x7xf32>
    %117 = arith.addf %114, %116 : vector<1x7xf32>
    %118 = vector.broadcast %20 : f32 to vector<1x7xf32>
    %119 = arith.mulf %118, %71 : vector<1x7xf32>
    %120 = arith.addf %117, %119 : vector<1x7xf32>
    %121 = vector.broadcast %21 : f32 to vector<1x7xf32>
    %122 = arith.mulf %121, %75 : vector<1x7xf32>
    %123 = arith.addf %120, %122 : vector<1x7xf32>
    %124 = vector.broadcast %23 : f32 to vector<1x7xf32>
    %125 = arith.addf %123, %124 : vector<1x7xf32>
    %126 = tpu.concatenate %100, %125 in 0 : vector<1x7xf32>, vector<1x7xf32> -> vector<2x7xf32>
    %c0_19 = arith.constant 0 : index
    %c0_20 = arith.constant 0 : index
    %127 = vector.load %arg2[%c0_19, %c0_20] : memref<2x7xf32, #tpu.memory_space<vmem>>, vector<2x7xf32>
    tpu.vector_store %arg2[%c0_19, %c0_20], %126 {strides = array<i32>} : memref<2x7xf32, #tpu.memory_space<vmem>>, vector<2x7xf32>,
    return
  }
}

</mosaic_0001>

<bundles_post_ra>
// kernel: model_forward.1
= control target key start
LH: loop header
LB: loop body
LE: loop exit
PB: predicated region body
PF: predicated region fallthrough
CT: control target
= control target key end

     0   :  { %7 = vsyncpa [#allocation4], 0  ;;  %s302_s0 = inlined_call_operand.vmem [shape: f32[24], index: 0, kind: input, shape index: {}]   ;;  %s303_s1 = inlined_call_operand.vmem [shape: f32[4,8], index: 1, kind: input, shape index: {}]   ;;  %s304_s2 = inlined_call_operand.hbm [shape: f32[2,7], index: 2, kind: output, shape index: {}]  }
   0x1   :  { %8 = vsyncpa [#allocation3], 0  ;;  %s14_s11 = sshll.u32 %s302_s0, 4  ;;  %s251_s12 = smov [#allocation2]   ;;  %s15_s11 = int_to_ptr.vmem [resolvable:$true] %s14_s11 }
   0x2   :  { %17 = dma.vmem_to_smem %s15_s11, 16, %s251_s12, [#allocation4]  }
   0x3   :  { %247 = dma.done.wait [#allocation4], 16  }
   0x4   :  { %248 = vsyncadd [#allocation4], 4294967280 }
   0x5   :  { %24 = sfence }
   0x6   :  { %s25_s13 = sld [smem:[#allocation2]]  ;;  %v49_v0 = vld [vmem:[%s303_s1] sm:$0x1]  ;;  %v52_v1 = vld [vmem:[%s303_s1 + $0x1] sm:$0x1]  ;;  %s252_s3 = smov 127  }
   0x7   :  { %s185_s14 = sld [smem:[#allocation2 + $0x1]]  ;;  %v59_v3 = vld [vmem:[%s303_s1 + $0x2] sm:$0x1]  ;;  %v61_v6 = vld [vmem:[%s303_s1 + $0x3] sm:$0x1]  ;;  %s175_s20 = sshll.u32 %s304_s2, 4  ;;  %s176_s20 = int_to_ptr.hbm [resolvable:$true] %s175_s20 }
   0x8   :  { %s188_s15 = sld [smem:[#allocation2 + $0x4]]  ;;  %vm164_vm0 = vcmask 1040384   ;;  %vm166_vm1 = vcmask 50176  }
   0x9   :  { %s272_s16 = sld [smem:[#allocation2 + $0x10]] }
   0xa   :  { %s186_s19 = sld [smem:[#allocation2 + $0x2]] }
   0xb   :  { %s187_s0 = sld [smem:[#allocation2 + $0x3]] }
   0xc   :  { %v50_v2 = vstv %s25_s13  ;;  %s280_s22 = sld [smem:[#allocation2 + $0x5]] }
   0xd   :  { %v51_v4 = vmul.f32 %v50_v2, %v49_v0  ;;  %v53_v5 = vstv %s185_s14  ;;  %v60_v7 = vmul.f32 %v59_v3, %v50_v2  ;;  %s288_s27 = sld [smem:[#allocation2 + $0x11]] }
   0xe   :  { %v54_v8 = vmul.f32 %v53_v5, %v52_v1  ;;  %v62_v9 = vmul.f32 %v61_v6, %v53_v5  ;;  %v56_v10 = vstv %s188_s15  ;;  %s192_s28 = sld [smem:[#allocation2 + $0x8]] }
   0xf   :  { %s204_s29 = sld [smem:[#allocation2 + $0x14]]  ;;  %v125_v18 = vstv %s272_s16  ;;  %s253_s16 = smov [#allocation5]  }
  0x10   :  { %v55_v11 = vadd.f32 %v54_v8, %v51_v4  ;;  %v66_v12 = vstv %s186_s19  ;;  %v63_v13 = vadd.f32 %v62_v9, %v60_v7  ;;  %s196_s1 = sld [smem:[#allocation2 + $0xc]]  ;;  %s173_s17 = sshll.u32 %s253_s16, 4  ;;  %s174_s17 = int_to_ptr.vmem [resolvable:$true] %s173_s17 }
  0x11   :  { %v67_v14 = vmul.f32 %v66_v12, %v49_v0  ;;  %v68_v15 = vstv %s187_s0  ;;  %v74_v23 = vmul.f32 %v66_v12, %v59_v3  ;;  %s193_s30 = sld [smem:[#allocation2 + $0x9]] }
  0x12   :  { %v57_v16 = vadd.f32 %v56_v10, %v55_v11  ;;  %v69_v17 = vmul.f32 %v68_v15, %v52_v1  ;;  %v71_v19 = vstv %s280_s22  ;;  %v64_v20 = vadd.f32 %v63_v13, %v56_v10  ;;  %s205_s4 = sld [smem:[#allocation2 + $0x15]] }
  0x13   :  { %v75_v24 = vmul.f32 %v68_v15, %v61_v6  ;;  %v132_v28 = vstv %s288_s27  ;;  %s197_s5 = sld [smem:[#allocation2 + $0xd]] }
  0x14   :  { %v58_v21 = vmax.f32 %v57_v16, 0.0  ;;  %v70_v22 = vadd.f32 %v69_v17, %v67_v14  ;;  %v292_v25 = vmax.f32 %v64_v20, 0.0  ;;  %v84_v32 = vstv %s192_s28  ;;  %s198_s6 = sld [smem:[#allocation2 + $0xe]] }
  0x15   :  { %v76_v30 = vadd.f32 %v75_v24, %v74_v23  ;;  %v145_v31 = vstv %s204_s29  ;;  %s199_s7 = sld [smem:[#allocation2 + $0xf]] }
  0x16   :  { %v126_v26 = vmul.f32 %v125_v18, %v58_v21  ;;  %v72_v27 = vadd.f32 %v71_v19, %v70_v22  ;;  %v146_v33 = vmul.f32 %v145_v31, %v292_v25  ;;  %v85_v36 = vmul.f32 %v84_v32, %v58_v21  ;;  %s190_s8 = sld [smem:[#allocation2 + $0x6]] }
  0x17   :  { %v77_v35 = vadd.f32 %v76_v30, %v71_v19  ;;  %v104_v37 = vstv %s196_s1  ;;  %v91_v38 = vstv %s193_s30  ;;  %s191_s9 = sld [smem:[#allocation2 + $0x7]] }
  0x18   :  { %128 = vrot.lane.b32.xlu0 %v126_v26, %s252_s3  ;;  %v73_v29 = vmax.f32 %v72_v27, 0.0  ;;  %148 = vrot.lane.b32.xlu2 %v146_v33, %s252_s3  ;;  %v105_v39 = vmul.f32 %v104_v37, %v292_v25  ;;  %v152_v42 = vstv %s205_s4  ;;  %s202_s10 = sld [smem:[#allocation2 + $0x12]] }
  0x19   :  { %v78_v41 = vmax.f32 %v77_v35, 0.0  ;;  %v111_v44 = vstv %s197_s5  ;;  %s203_s11 = sld [smem:[#allocation2 + $0x13]] }
  0x1a   :  { %v133_v34 = vmul.f32 %v132_v28, %v73_v29  ;;  %v92_v40 = vmul.f32 %v91_v38, %v73_v29  ;;  %v120_v46 = vstv %s198_s6  ;;  %s194_s12 = sld [smem:[#allocation2 + $0xa]] }
  0x1b   :  { %v153_v43 = vmul.f32 %v152_v42, %v78_v41  ;;  %v112_v45 = vmul.f32 %v111_v44, %v78_v41  ;;  %v122_v47 = vstv %s199_s7  ;;  %v121_v49 = vmul.f32 %v120_v46, %v58_v21  ;;  %s195_s13 = sld [smem:[#allocation2 + $0xb]] }
  0x1c   :  { %135 = vrot.lane.b32.xlu1 %v133_v34, %s252_s3  ;;  %v123_v48 = vmul.f32 %v122_v47, %v73_v29  ;;  %v79_v51 = vstv %s190_s8  ;;  %s207_s14 = sld [smem:[#allocation2 + $0x17]] }
  0x1d   :  { %v81_v52 = vstv %s191_s9  ;;  %v80_v57 = vmul.f32 %v79_v51, %v58_v21  ;;  %s206_s15 = sld [smem:[#allocation2 + $0x16]] }
  0x1e   :  { %v124_v50 = vadd.f32 %v123_v48, %v121_v49  ;;  %v139_v54 = vstv %s202_s10  ;;  %v82_v56 = vmul.f32 %v81_v52, %v73_v29 }
  0x1f   :  { %v140_v58 = vmul.f32 %v139_v54, %v292_v25  ;;  %v142_v60 = vstv %s203_s11 }
  0x20   :  { %87 = vrot.lane.b32.xlu0 %v85_v36, %s252_s3  ;;  %107 = vrot.lane.b32.xlu2 %v105_v39, %s252_s3  ;;  %v83_v62 = vadd.f32 %v82_v56, %v80_v57  ;;  %v143_v1 = vmul.f32 %v142_v60, %v78_v41  ;;  %v98_v3 = vstv %s194_s12 }
  0x21   :  { %v101_v5 = vstv %s195_s13  ;;  %v99_v7 = vmul.f32 %v98_v3, %v292_v25 }
  0x22   :  { %v102_v10 = vmul.f32 %v101_v5, %v78_v41  ;;  %v159_v14 = vstv %s207_s14 }
  0x23   :  { %v118_v20 = vstv %s206_s15 }
  0x24   :  { %94 = vrot.lane.b32.xlu1 %v92_v40, %s252_s3 }
  0x28   :  { %155 = vrot.lane.b32.xlu0 %v153_v43, %s252_s3 }
  0x2c   :  { %114 = vrot.lane.b32.xlu1 %v112_v45, %s252_s3 }
  0x72   :  { %v149_v63 = vpop.permute.xlu2 %148 }
  0x7a   :  { %v108_v13 = vpop.permute.xlu2 %107 }
  0x8a   :  { %v129_v53 = vpop.permute.xlu0 %128 }
  0x8b   :  { %v131_v55 = vadd.f32 %v129_v53, %v124_v50 }
  0x8e   :  { %v136_v59 = vpop.permute.xlu1 %135 }
  0x8f   :  { %v138_v61 = vadd.f32 %v136_v59, %v131_v55 }
  0x91   :  { %v141_v0 = vadd.f32 %v140_v58, %v138_v61 }
  0x92   :  { %v88_v2 = vpop.permute.xlu0 %87 }
  0x93   :  { %v90_v4 = vadd.f32 %v88_v2, %v83_v62  ;;  %v144_v6 = vadd.f32 %v143_v1, %v141_v0 }
  0x95   :  { %v151_v11 = vadd.f32 %v149_v63, %v144_v6 }
  0x96   :  { %v95_v8 = vpop.permute.xlu1 %94 }
  0x97   :  { %v97_v9 = vadd.f32 %v95_v8, %v90_v4 }
  0x99   :  { %v100_v12 = vadd.f32 %v99_v7, %v97_v9 }
  0x9a   :  { %v156_v15 = vpop.permute.xlu0 %155 }
  0x9b   :  { %v103_v16 = vadd.f32 %v102_v10, %v100_v12  ;;  %v158_v17 = vadd.f32 %v156_v15, %v151_v11 }
  0x9d   :  { %v110_v18 = vadd.f32 %v108_v13, %v103_v16  ;;  %v160_v19 = vadd.f32 %v159_v14, %v158_v17 }
  0x9e   :  { %v115_v21 = vpop.permute.xlu1 %114 }
  0x9f   :  { %v162_v22 = vrot.slane %v160_v19, 7  ;;  %v117_v23 = vadd.f32 %v115_v21, %v110_v18 }
  0xa1   :  { %v119_v24 = vadd.f32 %v118_v20, %v117_v23 }
  0xa3   :  { %v165_v25 = vsel %vm164_vm0, %v119_v24, %v162_v22 }
  0xa4   :  { %167 = vst.msk [vmem:[#allocation5] sm:$0x3] %vm166_vm1, %v165_v25 }
  0xa5   :  { %178 = dma.vmem_to_hbm [thread:$0]  %s174_s17, 32, %s176_s20, [#allocation3]  }
  0xa6   :  { %249 = dma.done.wait [#allocation3], 32  }
  0xa7   :  { %250 = vsyncadd [#allocation3], 4294967264 }
  0xa8   :  { %183 = vsyncpa [#allocation3], 1 }
  0xa9   :  { %184 = vsyncpa [#allocation4], 1 }

</bundles_post_ra>
